<compile_context>
chip_gen: v7x
topology: tpu7x:2x2x1
jax: 0.10.0
libtpu: 0.0.40
codegen_flags: <defaults>
</compile_context>

<pallas_src>
import functools
import math

import jax
import jax.numpy as jnp
from jax.experimental import pallas as pl
from jax.experimental.pallas import tpu as pltpu

HIDDEN_LAYERS = 3
HIDDEN_DIM = 32
INPUT_DIM = 3
OUTPUT_DIM = 2

_LANES = 128
_SUBLANES = 8


def _round_up(n, m):
    return ((n + m - 1) // m) * m


def _dnn_kernel(x_ref, w_in_ref, b_in_ref, w_h_ref, b_h_ref, w_out_ref, b_out_ref,
                o_ref):
    # Layout: batch on lanes.  x_ref: (INPUT_DIM, tile); weights torch-layout [out, in];
    # biases are column vectors (out, 1) broadcast along lanes.
    cdt = w_in_ref.dtype  # MXU compute dtype (f32 or bf16); accumulation always f32.

    # Input layer + ReLU  (bias/ReLU stay f32 -> cheap on v5e too)
    h = jnp.dot(w_in_ref[...], x_ref[...], preferred_element_type=jnp.float32)
    h = jnp.maximum(h + b_in_ref[...], 0.0)

    # Hidden stack: Linear + ReLU, statically unrolled (h stays (32, tile), lane-dense)
    for i in range(HIDDEN_LAYERS):
        h = jnp.dot(w_h_ref[i], h.astype(cdt), preferred_element_type=jnp.float32)
        h = jnp.maximum(h + b_h_ref[i], 0.0)

    # Dropout(p=0.5) -> identity at inference.

    # Output layer (no activation)
    out = jnp.dot(w_out_ref[...], h.astype(cdt), preferred_element_type=jnp.float32)
    o_ref[...] = (out + b_out_ref[...]).astype(o_ref.dtype)


@functools.partial(jax.jit, static_argnames=("batch_tile", "use_bf16"))
def dnn_forward(x, params, batch_tile=4096, use_bf16=False):
    """x: [B, INPUT_DIM] float32. Returns [B, OUTPUT_DIM] float32.

    batch_tile: max batch lanes per grid step (multiple of 128).
    use_bf16:   cast x + weights to bf16 for the MXU (f32 accumulation kept).
    """
    if batch_tile % _LANES != 0:
        raise ValueError("batch_tile must be a multiple of 128 (lane width)")

    w_in, b_in, w_h, b_h, w_out, b_out = params
    B = x.shape[0]

    # --- tile selection: single grid step when the lane-padded batch fits one tile;
    # otherwise tile = batch_tile and the "parallel" axis shards across v7x cores. -----
    Bp = _round_up(B, _LANES)
    if Bp <= batch_tile:
        tile = Bp                      # one grid step, no per-step overhead multiplication
    else:
        tile = batch_tile
        Bp = _round_up(B, tile)
    grid = (Bp // tile,)

    # --- optional bf16 MXU operands (host-side cast; biases stay f32) -----------------
    if use_bf16:
        x = x.astype(jnp.bfloat16)
        w_in = w_in.astype(jnp.bfloat16)
        w_h = w_h.astype(jnp.bfloat16)
        w_out = w_out.astype(jnp.bfloat16)

    # --- transpose batch onto lanes (+ zero-pad tail lanes): (B, 3) -> (3, Bp) --------
    xt = x.T
    if Bp != B:
        xt = jnp.pad(xt, ((0, 0), (0, Bp - B)))

    itemsize = xt.dtype.itemsize

    # --- tight VMEM budget (sublane-padded, lane-dense tiles; x/out double-buffered) --
    x_buf = _SUBLANES * tile * itemsize          # (3, tile) padded to 8 sublanes
    o_buf = _SUBLANES * tile * 4                 # (2, tile) padded to 8 sublanes
    h_buf = HIDDEN_DIM * tile * 4                # one live (32, tile) f32 intermediate
    param_buf = 256 * 1024                       # all params lane-padded (~152 KiB)
    vmem_needed = 2 * (x_buf + o_buf) + 3 * h_buf + 2 * param_buf
    vmem_limit = int(min(max(vmem_needed + (4 << 20), 16 << 20), 48 << 20))

    # --- advisory cost estimate so XLA can overlap this small custom call -------------
    flops_per_row = 2 * (INPUT_DIM * HIDDEN_DIM
                         + HIDDEN_LAYERS * HIDDEN_DIM * HIDDEN_DIM
                         + HIDDEN_DIM * OUTPUT_DIM)
    param_bytes = sum(math.prod(p.shape) * p.dtype.itemsize
                      for p in (w_in, b_in, w_h, b_h, w_out, b_out))
    cost = pl.CostEstimate(
        flops=Bp * flops_per_row,
        transcendentals=0,
        bytes_accessed=Bp * (INPUT_DIM * itemsize + OUTPUT_DIM * 4) + param_bytes,
    )

    out_t = pl.pallas_call(
        _dnn_kernel,
        out_shape=jax.ShapeDtypeStruct((OUTPUT_DIM, Bp), jnp.float32),
        grid_spec=pltpu.PrefetchScalarGridSpec(
            num_scalar_prefetch=0,
            grid=grid,
            in_specs=[
                # activations: batch (lanes) tiled, feature dim = full extent
                pl.BlockSpec((INPUT_DIM, tile), lambda i: (0, i)),
                # parameters: full arrays, same block every grid step (no re-DMA)
                pl.BlockSpec((HIDDEN_DIM, INPUT_DIM), lambda i: (0, 0)),
                pl.BlockSpec((HIDDEN_DIM, 1), lambda i: (0, 0)),
                pl.BlockSpec((HIDDEN_LAYERS, HIDDEN_DIM, HIDDEN_DIM),
                             lambda i: (0, 0, 0)),
                pl.BlockSpec((HIDDEN_LAYERS, HIDDEN_DIM, 1), lambda i: (0, 0, 0)),
                pl.BlockSpec((OUTPUT_DIM, HIDDEN_DIM), lambda i: (0, 0)),
                pl.BlockSpec((OUTPUT_DIM, 1), lambda i: (0, 0)),
            ],
            out_specs=pl.BlockSpec((OUTPUT_DIM, tile), lambda i: (0, i)),
        ),
        compiler_params=pltpu.CompilerParams(
            dimension_semantics=("parallel",),
            vmem_limit_bytes=vmem_limit,
        ),
        cost_estimate=cost,
    )(xt, w_in, b_in, w_h, b_h, w_out, b_out)

    out = out_t.T                               # (Bp, OUTPUT_DIM)
    return out[:B] if Bp != B else out


def init_params(key):
    """Deterministic synthetic init matching the torch module's shapes.
    Weights kept in torch layout [out, in]; biases as column vectors [out, 1]."""
    ks = jax.random.split(key, 2 + 2 * HIDDEN_LAYERS + 2)
    k = iter(ks)

    def lin_w(kin, fan_in, fan_out):
        bound = 1.0 / math.sqrt(fan_in)
        return jax.random.uniform(kin, (fan_out, fan_in), jnp.float32,
                                  minval=-bound, maxval=bound)

    def lin_b(kin, fan_in, fan_out):
        bound = 1.0 / math.sqrt(fan_in)
        return jax.random.uniform(kin, (fan_out, 1), jnp.float32,
                                  minval=-bound, maxval=bound)

    w_in = lin_w(next(k), INPUT_DIM, HIDDEN_DIM)        # (32, 3)
    b_in = lin_b(next(k), INPUT_DIM, HIDDEN_DIM)        # (32, 1)
    w_hs, b_hs = [], []
    for _ in range(HIDDEN_LAYERS):
        w_hs.append(lin_w(next(k), HIDDEN_DIM, HIDDEN_DIM))
        b_hs.append(lin_b(next(k), HIDDEN_DIM, HIDDEN_DIM))
    w_h = jnp.stack(w_hs, axis=0)                       # (3, 32, 32)
    b_h = jnp.stack(b_hs, axis=0)                       # (3, 32, 1)
    w_out = lin_w(next(k), HIDDEN_DIM, OUTPUT_DIM)      # (2, 32)
    b_out = lin_b(next(k), HIDDEN_DIM, OUTPUT_DIM)      # (2, 1)
    return (w_in, b_in, w_h, b_h, w_out, b_out)


def dnn_reference(x, params):
    """Pure-JAX reference of the same forward (inference mode)."""
    w_in, b_in, w_h, b_h, w_out, b_out = params
    h = jnp.maximum(x @ w_in.T + b_in[:, 0], 0.0)
    for i in range(HIDDEN_LAYERS):
        h = jnp.maximum(h @ w_h[i].T + b_h[i, :, 0], 0.0)
    return h @ w_out.T + b_out[:, 0]


if __name__ == "__main__":
    key = jax.random.PRNGKey(0)
    kx, kp = jax.random.split(key)
    params = init_params(kp)

    # Small-shape smoke test: B=64 -> single grid step of 128 lanes (batch on lanes).
    B = 64
    x = jax.random.normal(kx, (B, INPUT_DIM), jnp.float32)
    ref = dnn_reference(x, params)

    out = jax.block_until_ready(dnn_forward(x, params))
    assert out.shape == (B, OUTPUT_DIM)
    assert jnp.allclose(out, ref, atol=1e-4, rtol=1e-4), "f32 mismatch vs reference"

    # Ragged batch (not a multiple of 128) is lane-padded and sliced in the wrapper.
    xr = x[:50]
    outr = jax.block_until_ready(dnn_forward(xr, params))
    assert outr.shape == (50, OUTPUT_DIM)
    assert jnp.allclose(outr, ref[:50], atol=1e-4, rtol=1e-4), "ragged-batch mismatch"

    # Multi-step grid path (batch_tile=128 -> 3 grid steps over a padded 384-lane batch).
    km = jax.random.PRNGKey(1)
    Bm = 300
    xm = jax.random.normal(km, (Bm, INPUT_DIM), jnp.float32)
    refm = dnn_reference(xm, params)
    outm = jax.block_until_ready(dnn_forward(xm, params, batch_tile=128))
    assert outm.shape == (Bm, OUTPUT_DIM)
    assert jnp.allclose(outm, refm, atol=1e-4, rtol=1e-4), "multi-step grid mismatch"

    # bf16 MXU path (f32 accumulation + f32 bias/ReLU), tightened tolerance.
    outb = jax.block_until_ready(dnn_forward(x, params, use_bf16=True))
    assert outb.shape == (B, OUTPUT_DIM)
    assert bool(jnp.all(jnp.isfinite(outb)))
    max_ref = float(jnp.max(jnp.abs(ref)))
    assert float(jnp.max(jnp.abs(outb - ref))) < 0.02 * (1.0 + max_ref), "bf16 path diverged"

    print("KERNEL_OK")
</pallas_src>

<mosaic_0001>
module attributes {stable_mosaic.version = 11 : i64} {
  func.func @_dnn_kernel(%arg0: i32, %arg1: memref<3x128xf32, #tpu.memory_space<vmem>>, %arg2: memref<32x3xf32, #tpu.memory_space<vmem>>, %arg3: memref<32x1xf32, #tpu.memory_space<vmem>>, %arg4: memref<3x32x32xf32, #tpu.memory_space<vmem>>, %arg5: memref<3x32x1xf32, #tpu.memory_space<vmem>>, %arg6: memref<2x32xf32, #tpu.memory_space<vmem>>, %arg7: memref<2x1xf32, #tpu.memory_space<vmem>>, %arg8: memref<2x128xf32, #tpu.memory_space<vmem>>) attributes {dimension_semantics = [#tpu.dimension_semantics<parallel>], iteration_bounds = array<i64: 1>, scalar_prefetch = 0 : i64, scratch_operands = 0 : i64, tpu.core_type = #tpu.core_type<tc>, window_params = [{transform_indices = @transform_0, window_bounds = array<i64: 3, 128>}, {pipeline_mode = #tpu.pipeline_mode<synchronous>, transform_indices = @transform_1, window_bounds = array<i64: 32, 3>}, {pipeline_mode = #tpu.pipeline_mode<synchronous>, transform_indices = @transform_2, window_bounds = array<i64: 32, 1>}, {pipeline_mode = #tpu.pipeline_mode<synchronous>, transform_indices = @transform_3, window_bounds = array<i64: 3, 32, 32>}, {pipeline_mode = #tpu.pipeline_mode<synchronous>, transform_indices = @transform_4, window_bounds = array<i64: 3, 32, 1>}, {pipeline_mode = #tpu.pipeline_mode<synchronous>, transform_indices = @transform_5, window_bounds = array<i64: 2, 32>}, {pipeline_mode = #tpu.pipeline_mode<synchronous>, transform_indices = @transform_6, window_bounds = array<i64: 2, 1>}, {transform_indices = @transform_7, window_bounds = array<i64: 2, 128>}]} {
    %c0 = arith.constant 0 : index
    %c0_0 = arith.constant 0 : index
    %0 = vector.load %arg2[%c0, %c0_0] : memref<32x3xf32, #tpu.memory_space<vmem>>, vector<32x3xf32>
    %c0_1 = arith.constant 0 : index
    %c0_2 = arith.constant 0 : index
    %1 = vector.load %arg1[%c0_1, %c0_2] : memref<3x128xf32, #tpu.memory_space<vmem>>, vector<3x128xf32>
    %cst = arith.constant dense<0.000000e+00> : vector<32x128xf32>
    %2 = tpu.matmul %0, %1, %cst {dimension_numbers = #tpu.dot_dimension_numbers<[1], [0], [0], [1], [0, 0, 1, 1], [], []>} : vector<32x3xf32>, vector<3x128xf32>, vector<32x128xf32> -> vector<32x128xf32>
    %c0_3 = arith.constant 0 : index
    %c0_4 = arith.constant 0 : index
    %3 = vector.load %arg3[%c0_3, %c0_4] : memref<32x1xf32, #tpu.memory_space<vmem>>, vector<32x1xf32>
    %4 = vector.broadcast %3 : vector<32x1xf32> to vector<32x128xf32>
    %5 = arith.addf %2, %4 : vector<32x128xf32>
    %cst_5 = arith.constant 0.000000e+00 : f32
    %6 = vector.broadcast %cst_5 : f32 to vector<32x128xf32>
    %7 = arith.maximumf %5, %6 : vector<32x128xf32>
    %c0_6 = arith.constant 0 : index
    %c0_7 = arith.constant 0 : index
    %c0_8 = arith.constant 0 : index
    %8 = vector.load %arg4[%c0_6, %c0_7, %c0_8] : memref<3x32x32xf32, #tpu.memory_space<vmem>>, vector<1x32x32xf32>
    %9 = vector.shape_cast %8 : vector<1x32x32xf32> to vector<32x32xf32>
    %cst_9 = arith.constant dense<0.000000e+00> : vector<32x128xf32>
    %10 = tpu.matmul %9, %7, %cst_9 {dimension_numbers = #tpu.dot_dimension_numbers<[1], [0], [0], [1], [0, 0, 1, 1], [], []>} : vector<32x32xf32>, vector<32x128xf32>, vector<32x128xf32> -> vector<32x128xf32>
    %c0_10 = arith.constant 0 : index
    %c0_11 = arith.constant 0 : index
    %c0_12 = arith.constant 0 : index
    %11 = vector.load %arg5[%c0_10, %c0_11, %c0_12] : memref<3x32x1xf32, #tpu.memory_space<vmem>>, vector<1x32x1xf32>
    %12 = vector.shape_cast %11 : vector<1x32x1xf32> to vector<32x1xf32>
    %13 = vector.broadcast %12 : vector<32x1xf32> to vector<32x128xf32>
    %14 = arith.addf %10, %13 : vector<32x128xf32>
    %cst_13 = arith.constant 0.000000e+00 : f32
    %15 = vector.broadcast %cst_13 : f32 to vector<32x128xf32>
    %16 = arith.maximumf %14, %15 : vector<32x128xf32>
    %c1 = arith.constant 1 : index
    %c0_14 = arith.constant 0 : index
    %c0_15 = arith.constant 0 : index
    %17 = vector.load %arg4[%c1, %c0_14, %c0_15] : memref<3x32x32xf32, #tpu.memory_space<vmem>>, vector<1x32x32xf32>
    %18 = vector.shape_cast %17 : vector<1x32x32xf32> to vector<32x32xf32>
    %cst_16 = arith.constant dense<0.000000e+00> : vector<32x128xf32>
    %19 = tpu.matmul %18, %16, %cst_16 {dimension_numbers = #tpu.dot_dimension_numbers<[1], [0], [0], [1], [0, 0, 1, 1], [], []>} : vector<32x32xf32>, vector<32x128xf32>, vector<32x128xf32> -> vector<32x128xf32>
    %c1_17 = arith.constant 1 : index
    %c0_18 = arith.constant 0 : index
    %c0_19 = arith.constant 0 : index
    %20 = vector.load %arg5[%c1_17, %c0_18, %c0_19] : memref<3x32x1xf32, #tpu.memory_space<vmem>>, vector<1x32x1xf32>
    %21 = vector.shape_cast %20 : vector<1x32x1xf32> to vector<32x1xf32>
    %22 = vector.broadcast %21 : vector<32x1xf32> to vector<32x128xf32>
    %23 = arith.addf %19, %22 : vector<32x128xf32>
    %cst_20 = arith.constant 0.000000e+00 : f32
    %24 = vector.broadcast %cst_20 : f32 to vector<32x128xf32>
    %25 = arith.maximumf %23, %24 : vector<32x128xf32>
    %c2 = arith.constant 2 : index
    %c0_21 = arith.constant 0 : index
    %c0_22 = arith.constant 0 : index
    %26 = vector.load %arg4[%c2, %c0_21, %c0_22] : memref<3x32x32xf32, #tpu.memory_space<vmem>>, vector<1x32x32xf32>
    %27 = vector.shape_cast %26 : vector<1x32x32xf32> to vector<32x32xf32>
    %cst_23 = arith.constant dense<0.000000e+00> : vector<32x128xf32>
    %28 = tpu.matmul %27, %25, %cst_23 {dimension_numbers = #tpu.dot_dimension_numbers<[1], [0], [0], [1], [0, 0, 1, 1], [], []>} : vector<32x32xf32>, vector<32x128xf32>, vector<32x128xf32> -> vector<32x128xf32>
    %c2_24 = arith.constant 2 : index
    %c0_25 = arith.constant 0 : index
    %c0_26 = arith.constant 0 : index
    %29 = vector.load %arg5[%c2_24, %c0_25, %c0_26] : memref<3x32x1xf32, #tpu.memory_space<vmem>>, vector<1x32x1xf32>
    %30 = vector.shape_cast %29 : vector<1x32x1xf32> to vector<32x1xf32>
    %31 = vector.broadcast %30 : vector<32x1xf32> to vector<32x128xf32>
    %32 = arith.addf %28, %31 : vector<32x128xf32>
    %cst_27 = arith.constant 0.000000e+00 : f32
    %33 = vector.broadcast %cst_27 : f32 to vector<32x128xf32>
    %34 = arith.maximumf %32, %33 : vector<32x128xf32>
    %c0_28 = arith.constant 0 : index
    %c0_29 = arith.constant 0 : index
    %35 = vector.load %arg6[%c0_28, %c0_29] : memref<2x32xf32, #tpu.memory_space<vmem>>, vector<2x32xf32>
    %cst_30 = arith.constant dense<0.000000e+00> : vector<2x128xf32>
    %36 = tpu.matmul %35, %34, %cst_30 {dimension_numbers = #tpu.dot_dimension_numbers<[1], [0], [0], [1], [0, 0, 1, 1], [], []>} : vector<2x32xf32>, vector<32x128xf32>, vector<2x128xf32> -> vector<2x128xf32>
    %c0_31 = arith.constant 0 : index
    %c0_32 = arith.constant 0 : index
    %37 = vector.load %arg7[%c0_31, %c0_32] : memref<2x1xf32, #tpu.memory_space<vmem>>, vector<2x1xf32>
    %38 = vector.broadcast %37 : vector<2x1xf32> to vector<2x128xf32>
    %39 = arith.addf %36, %38 : vector<2x128xf32>
    %c0_33 = arith.constant 0 : index
    %c0_34 = arith.constant 0 : index
    %40 = vector.load %arg8[%c0_33, %c0_34] : memref<2x128xf32, #tpu.memory_space<vmem>>, vector<2x128xf32>
    tpu.vector_store %arg8[%c0_33, %c0_34], %39 {strides = array<i32>} : memref<2x128xf32, #tpu.memory_space<vmem>>, vector<2x128xf32>,
    return
  }
  func.func @transform_0(%arg0: i32) -> (i32, i32) {
    %c0_i32 = arith.constant 0 : i32
    %c0_i32_0 = arith.constant 0 : i32
    return %c0_i32, %arg0 : i32, i32
  }
  func.func @transform_1(%arg0: i32) -> (i32, i32) {
    %c0_i32 = arith.constant 0 : i32
    %c0_i32_0 = arith.constant 0 : i32
    %c0_i32_1 = arith.constant 0 : i32
    return %c0_i32, %c0_i32_0 : i32, i32
  }
  func.func @transform_2(%arg0: i32) -> (i32, i32) {
    %c0_i32 = arith.constant 0 : i32
    %c0_i32_0 = arith.constant 0 : i32
    %c0_i32_1 = arith.constant 0 : i32
    return %c0_i32, %c0_i32_0 : i32, i32
  }
  func.func @transform_3(%arg0: i32) -> (i32, i32, i32) {
    %c0_i32 = arith.constant 0 : i32
    %c0_i32_0 = arith.constant 0 : i32
    %c0_i32_1 = arith.constant 0 : i32
    %c0_i32_2 = arith.constant 0 : i32
    return %c0_i32, %c0_i32_0, %c0_i32_1 : i32, i32, i32
  }
  func.func @transform_4(%arg0: i32) -> (i32, i32, i32) {
    %c0_i32 = arith.constant 0 : i32
    %c0_i32_0 = arith.constant 0 : i32
    %c0_i32_1 = arith.constant 0 : i32
    %c0_i32_2 = arith.constant 0 : i32
    return %c0_i32, %c0_i32_0, %c0_i32_1 : i32, i32, i32
  }
  func.func @transform_5(%arg0: i32) -> (i32, i32) {
    %c0_i32 = arith.constant 0 : i32
    %c0_i32_0 = arith.constant 0 : i32
    %c0_i32_1 = arith.constant 0 : i32
    return %c0_i32, %c0_i32_0 : i32, i32
  }
  func.func @transform_6(%arg0: i32) -> (i32, i32) {
    %c0_i32 = arith.constant 0 : i32
    %c0_i32_0 = arith.constant 0 : i32
    %c0_i32_1 = arith.constant 0 : i32
    return %c0_i32, %c0_i32_0 : i32, i32
  }
  func.func @transform_7(%arg0: i32) -> (i32, i32) {
    %c0_i32 = arith.constant 0 : i32
    %c0_i32_0 = arith.constant 0 : i32
    return %c0_i32, %arg0 : i32, i32
  }
}

</mosaic_0001>

<bundles_post_ra>
// kernel: dnn_forward.1
= control target key start
LH: loop header
LB: loop body
LE: loop exit
PB: predicated region body
PF: predicated region fallthrough
CT: control target
= control target key end

     0   :  { %vm69_vm0 = vcmask 1042432   ;;  %vm56_vm1 = vcmask 23552   ;;  %v839_v5 = vmov 0   ;;  %s1018_s0 = inlined_call_operand.vmem [shape: f32[3,128], index: 0, kind: input, shape index: {}]   ;;  %s1019_s1 = inlined_call_operand.vmem [shape: f32[32,3], index: 1, kind: input, shape index: {}]   ;;  %s1020_s2 = inlined_call_operand.vmem [shape: f32[32,1], index: 2, kind: input, shape index: {}]   ;;  %s1021_s3 = inlined_call_operand.vmem [shape: f32[3,32,32], index: 3, kind: input, shape index: {}]   ;;  %s1022_s4 = inlined_call_operand.vmem [shape: f32[3,32,1], index: 4, kind: input, shape index: {}]   ;;  %s1023_s5 = inlined_call_operand.vmem [shape: f32[2,32], index: 5, kind: input, shape index: {}]   ;;  %s1024_s6 = inlined_call_operand.vmem [shape: f32[2,1], index: 6, kind: input, shape index: {}]   ;;  %s1025_s7 = inlined_call_operand.hbm [shape: f32[2,128], index: 7, kind: output, shape index: {}]  }
   0x1   :  { %v31_v0 = vld [vmem:[%s1018_s0] sm:$0x7]  ;;  %v28_v2 = vld [vmem:[%s1019_s1 + $0x8] sm:$0xff]  ;;  %v29_v3 = vld [vmem:[%s1019_s1 + $0x10] sm:$0xff]  ;;  %813 = vset.pattern.permute.xlu0 %v839_v5  ;;  %814 = vset.pattern.permute.xlu1 %v839_v5 }
   0x2   :  { %v27_v1 = vld [vmem:[%s1019_s1] sm:$0xff]  ;;  %717 = vmatprep.subr.msk.mxu0 %vm69_vm0, %v31_v0  ;;  %v34_v6 = vld [vmem:[%s1020_s2 + $0x10] sm:$0xff]  ;;  %v30_v7 = vld [vmem:[%s1019_s1 + $0x18] sm:$0xff] }
   0x3   :  { %719 = vmatprep.mubr.msk.f32.mxu0 %vm56_vm1, %v27_v1  ;;  %v32_v4 = vld [vmem:[%s1020_s2] sm:$0xff]  ;;  %718 = vmatpush3.msk.msra.mxu0 %vm69_vm0, %v31_v0  ;;  %v33_v8 = vld [vmem:[%s1020_s2 + $0x8] sm:$0xff]  ;;  %v35_v9 = vld [vmem:[%s1020_s2 + $0x18] sm:$0xff] }
   0x4   :  { %720 = vmatmul.mubr.msk.f32.vlgmr.msra.gmra.mrb[0].mxu0 %vm56_vm1, %v28_v2  ;;  %38 = vperm.xlu0 %813, %v32_v4  }
   0x5   :  { %722 = vmatprep.mubr.msk.f32.mxu0 %vm56_vm1, %v29_v3  ;;  %48 = vperm.xlu1 %814, %v34_v6  }
   0x8   :  { %723 = vmatmul.mubr.msk.f32.gmra.mrb[2].mxu0 %vm56_vm1, %v30_v7  ;;  %43 = vperm.xlu0 %813, %v33_v8  }
   0x9   :  { %12 = vsyncpa [#allocation3], 0  ;;  %v166_v10 = vld [vmem:[%s1022_s4] sm:$0xff]  ;;  %53 = vperm.xlu1 %814, %v35_v9   ;;  %v167_v11 = vld [vmem:[%s1022_s4 + $0x8] sm:$0xff]  ;;  %vm190_vm2 = vcmask 261120   ;;  %vm841_vm3 = vmmov 0  }
   0xa   :  { %v168_v12 = vld [vmem:[%s1022_s4 + $0x10] sm:$0xff]  ;;  %v169_v13 = vld [vmem:[%s1022_s4 + $0x18] sm:$0xff]  ;;  %v662_v14 = vld [vmem:[%s1022_s4 + $0x20] sm:$0xff]  ;;  %s843_s15 = smov [#allocation2]  }
   0xb   :  { %v663_v15 = vld [vmem:[%s1022_s4 + $0x28] sm:$0xff]  ;;  %v664_v16 = vld [vmem:[%s1022_s4 + $0x30] sm:$0xff]  ;;  %v665_v17 = vld [vmem:[%s1022_s4 + $0x38] sm:$0xff]  ;;  %s641_s16 = sshll.u32 %s843_s15, 4  ;;  %s642_s16 = int_to_ptr.vmem [resolvable:$true] %s641_s16 }
   0xc   :  { %172 = vperm.xlu0 %813, %v166_v10   ;;  %v674_v18 = vld [vmem:[%s1022_s4 + $0x40] sm:$0xff]  ;;  %v675_v19 = vld [vmem:[%s1022_s4 + $0x48] sm:$0xff]  ;;  %v676_v20 = vld [vmem:[%s1022_s4 + $0x50] sm:$0xff]  ;;  %s815_s17 = scalar_lea.vmem %s642_s16, 32  ;;  %p820_p1 = scmp.lt.s32.totalorder %s642_s16, %s642_s16 }
   0xd   :  { %177 = vperm.xlu1 %814, %v167_v11   ;;  %v677_v21 = vld [vmem:[%s1022_s4 + $0x58] sm:$0xff]  ;;  %v555_v22 = vld [vmem:[%s1024_s6] sm:$0x3]  ;;  %v163_v42 = vld [vmem:[%s1021_s3 + $0x8] sm:$0xff]  ;;  %p816_p0 = scmp.ne.s32.totalorder %s642_s16, %s815_s17  ;;  %p821_p2 = scmp.lt.s32.totalorder %s815_s17, %s815_s17 }
   0xe   :  { %v162_v23 = vld [vmem:[%s1021_s3] sm:$0xff]  ;;  %v164_v43 = vld [vmem:[%s1021_s3 + $0x10] sm:$0xff]  ;;  %v165_v44 = vld [vmem:[%s1021_s3 + $0x18] sm:$0xff] }
   0xf   :  { %733 = vmatprep.mubr.msk.f32.mxu1 %vm190_vm2, %v162_v23  ;;  %v658_v45 = vld [vmem:[%s1021_s3 + $0x20] sm:$0xff]  ;;  %v659_v0 = vld [vmem:[%s1021_s3 + $0x28] sm:$0xff]  ;;  %v660_v1 = vld [vmem:[%s1021_s3 + $0x30] sm:$0xff]  ;;  %p822_p3 = por %p821_p2, %p820_p1 }
  0x10   :  { %182 = vperm.xlu0 %813, %v168_v12   ;;  %747 = vmatprep.mubr.msk.f32.mxu0 %vm190_vm2, %v658_v45  ;;  %v661_v2 = vld [vmem:[%s1021_s3 + $0x38] sm:$0xff]  ;;  %v670_v3 = vld [vmem:[%s1021_s3 + $0x40] sm:$0xff]  ;;  %v672_v23 = vld [vmem:[%s1021_s3 + $0x50] sm:$0xff] }
  0x11   :  { %187 = vperm.xlu1 %814, %v169_v13   ;;  %v554_v45 = vld [vmem:[%s1023_s5] sm:$0x3]  ;;  %p823_p4 = pnand %p822_p3, %p816_p0 }
  0x14   :  { %304 = vperm.xlu0 %813, %v662_v14  }
  0x15   :  { %309 = vperm.xlu1 %814, %v663_v15  }
  0x18   :  { %314 = vperm.xlu0 %813, %v664_v16  }
  0x19   :  { %319 = vperm.xlu1 %814, %v665_v17  }
  0x1c   :  { %435 = vperm.xlu0 %813, %v674_v18  }
  0x1d   :  { %440 = vperm.xlu1 %814, %v675_v19  }
  0x20   :  { %445 = vperm.xlu0 %813, %v676_v20  }
  0x21   :  { %450 = vperm.xlu1 %814, %v677_v21  }
  0x24   :  { %558 = vperm.xlu0 %813, %v555_v22   ;;  %v671_v22 = vld [vmem:[%s1021_s3 + $0x48] sm:$0xff] }
  0x83   :  { %v39_v24 = vpop.permute.xlu0 %38 }
  0x84   :  { %v49_v25 = vpop.permute.xlu1 %48 }
  0x87   :  { %v44_v26 = vpop.permute.xlu0 %43 }
  0x88   :  { %v54_v32 = vpop.permute.xlu1 %53 }
  0x8b   :  { %v173_v47 = vpop.permute.xlu0 %172 }
  0x8c   :  { %v178_v46 = vpop.permute.xlu1 %177 }
  0x8f   :  { %v183_v56 = vpop.permute.xlu0 %182 }
  0x90   :  { %v188_v53 = vpop.permute.xlu1 %187 }
  0x93   :  { %v305_v5 = vpop.permute.xlu0 %304 }
  0x94   :  { %v310_v4 = vpop.permute.xlu1 %309 }
  0x97   :  { %v315_v14 = vpop.permute.xlu0 %314 }
  0x98   :  { %v320_v11 = vpop.permute.xlu1 %319 }
  0xd7   :  { %v721_v27 = vpop.f32.mrb[0].mxu0 }
  0xd8   :  { %v145_v28 = vadd.f32 %v721_v27, %v44_v26  ;;  %v139_v29 = vpop.f32.mrb[1].mxu0  ;;  %v842_v26 = vmov 0.0   ;;  %v441_v27 = vpop.permute.xlu1 %440 }
  0xd9   :  { %v140_v30 = vadd.f32 %v139_v29, %v39_v24  ;;  %v673_v24 = vld [vmem:[%s1021_s3 + $0x58] sm:$0xff] }
  0xda   :  { %v159_v31 = vmax.f32 %v145_v28, 0.0  ;;  %v436_v28 = vpop.permute.xlu0 %435 }
  0xdb   :  { %v158_v33 = vmax.f32 %v140_v30, 0.0  ;;  %v724_v34 = vpop.f32.mrb[2].mxu0 }
  0xdc   :  { %v155_v35 = vadd.f32 %v724_v34, %v54_v32  ;;  %v149_v36 = vpop.f32.mrb[3].mxu0  ;;  %v451_v34 = vpop.permute.xlu1 %450 }
  0xdd   :  { %v150_v37 = vadd.f32 %v149_v36, %v49_v25  ;;  %v778_v38 = vpack.c.bf16 %v159_v31, %v158_v33  ;;  %v840_v25 = vmov 0.0|0.0  }
  0xde   :  { %v161_v39 = vmax.f32 %v155_v35, 0.0 }
  0xdf   :  { %v160_v40 = vmax.f32 %v150_v37, 0.0  ;;  %779 = vmatprep.subr.bf16.mxu1 %v778_v38  ;;  %v446_v37 = vpop.permute.xlu0 %445 }
  0xe0   :  { %781 = vmatpush3.bf16.msra.mxu1 %v778_v38 }
  0xe1   :  { %v782_v41 = vpack.c.bf16 %v161_v39, %v160_v40 }
  0xe3   :  { %783 = vmatprep.subr.bf16.mxu1 %v782_v41 }
  0xe4   :  { %785 = vmatpush3.bf16.msra.mxu1 %v782_v41 }
  0xe7   :  { %734 = vmatmul.mubr.msk.f32.vlgmr.msra.gmra.mrb[0].mxu1 %vm190_vm2, %v163_v42 }
  0xe8   :  { %736 = vmatprep.mubr.msk.f32.mxu1 %vm190_vm2, %v164_v43 }
  0xeb   :  { %737 = vmatmul.mubr.msk.f32.gmra.mrb[2].mxu1 %vm190_vm2, %v165_v44 }
  0xec   :  { %761 = vmatprep.mubr.msk.f32.mxu1 %vm190_vm2, %v670_v3 }
 0x1ba   :  { %v735_v48 = vpop.f32.mrb[0].mxu1 }
 0x1bb   :  { %v275_v49 = vadd.f32 %v735_v48, %v178_v46  ;;  %v269_v50 = vpop.f32.mrb[1].mxu1  ;;  %v559_v46 = vpop.permute.xlu0 %558 }
 0x1bc   :  { %v270_v51 = vadd.f32 %v269_v50, %v173_v47 }
 0x1bd   :  { %v289_v52 = vmax.f32 %v275_v49, 0.0 }
 0x1be   :  { %v288_v54 = vmax.f32 %v270_v51, 0.0  ;;  %v738_v55 = vpop.f32.mrb[2].mxu1 }
 0x1bf   :  { %v285_v57 = vadd.f32 %v738_v55, %v188_v53  ;;  %v279_v58 = vpop.f32.mrb[3].mxu1 }
 0x1c0   :  { %v786_v59 = vpack.c.bf16 %v289_v52, %v288_v54  ;;  %v280_v60 = vadd.f32 %v279_v58, %v183_v56 }
 0x1c1   :  { %v291_v61 = vmax.f32 %v285_v57, 0.0 }
 0x1c2   :  { %v290_v62 = vmax.f32 %v280_v60, 0.0  ;;  %787 = vmatprep.subr.bf16.mxu0 %v786_v59 }
 0x1c3   :  { %789 = vmatpush3.bf16.msra.mxu0 %v786_v59 }
 0x1c4   :  { %v790_v63 = vpack.c.bf16 %v291_v61, %v290_v62 }
 0x1c6   :  { %791 = vmatprep.subr.bf16.mxu0 %v790_v63 }
 0x1c7   :  { %793 = vmatpush3.bf16.msra.mxu0 %v790_v63 }
 0x1c8   :  { %802 = vmatprep.subr.bf16.mxu0 %v840_v25 }
 0x1ca   :  { %748 = vmatmul.mubr.msk.f32.vlgmr.msra.gmra.mrb[4].mxu0 %vm190_vm2, %v659_v0 }
 0x1cb   :  { %750 = vmatprep.mubr.msk.f32.mxu0 %vm190_vm2, %v660_v1 }
 0x1ce   :  { %751 = vmatmul.mubr.msk.f32.gmra.mrb[6].mxu0 %vm190_vm2, %v661_v2 }
 0x1cf   :  { %775 = vmatprep.mubr.msk.f32.mxu0 %vm841_vm3, %v842_v26 }
 0x29d   :  { %v749_v6 = vpop.f32.mrb[4].mxu0 }
 0x29e   :  { %v406_v7 = vadd.f32 %v749_v6, %v310_v4  ;;  %v400_v8 = vpop.f32.mrb[5].mxu0 }
 0x29f   :  { %v401_v9 = vadd.f32 %v400_v8, %v305_v5 }
 0x2a0   :  { %v420_v10 = vmax.f32 %v406_v7, 0.0 }
 0x2a1   :  { %v419_v12 = vmax.f32 %v401_v9, 0.0  ;;  %v752_v13 = vpop.f32.mrb[6].mxu0 }
 0x2a2   :  { %v416_v15 = vadd.f32 %v752_v13, %v320_v11  ;;  %v410_v16 = vpop.f32.mrb[7].mxu0 }
 0x2a3   :  { %v794_v17 = vpack.c.bf16 %v420_v10, %v419_v12  ;;  %v411_v18 = vadd.f32 %v410_v16, %v315_v14 }
 0x2a4   :  { %v422_v19 = vmax.f32 %v416_v15, 0.0 }
 0x2a5   :  { %v421_v20 = vmax.f32 %v411_v18, 0.0  ;;  %795 = vmatprep.subr.bf16.mxu1 %v794_v17 }
 0x2a6   :  { %797 = vmatpush3.bf16.msra.mxu1 %v794_v17 }
 0x2a7   :  { %v798_v21 = vpack.c.bf16 %v422_v19, %v421_v20 }
 0x2a9   :  { %799 = vmatprep.subr.bf16.mxu1 %v798_v21 }
 0x2aa   :  { %801 = vmatpush3.bf16.msra.mxu1 %v798_v21 }
 0x2ad   :  { %762 = vmatmul.mubr.msk.f32.vlgmr.msra.gmra.mrb[4].mxu1 %vm190_vm2, %v671_v22 }
 0x2ae   :  { %764 = vmatprep.mubr.msk.f32.mxu1 %vm190_vm2, %v672_v23 }
 0x2b1   :  { %765 = vmatmul.mubr.msk.f32.gmra.mrb[6].mxu1 %vm190_vm2, %v673_v24 }
 0x380   :  { %v763_v29 = vpop.f32.mrb[4].mxu1 }
 0x381   :  { %v537_v30 = vadd.f32 %v763_v29, %v441_v27  ;;  %v531_v31 = vpop.f32.mrb[5].mxu1 }
 0x382   :  { %v532_v32 = vadd.f32 %v531_v31, %v436_v28 }
 0x383   :  { %v551_v33 = vmax.f32 %v537_v30, 0.0 }
 0x384   :  { %v550_v35 = vmax.f32 %v532_v32, 0.0  ;;  %v766_v36 = vpop.f32.mrb[6].mxu1 }
 0x385   :  { %v547_v38 = vadd.f32 %v766_v36, %v451_v34  ;;  %v541_v39 = vpop.f32.mrb[7].mxu1 }
 0x386   :  { %v803_v40 = vpack.c.bf16 %v551_v33, %v550_v35  ;;  %v542_v41 = vadd.f32 %v541_v39, %v446_v37 }
 0x387   :  { %v553_v42 = vmax.f32 %v547_v38, 0.0 }
 0x388   :  { %v552_v43 = vmax.f32 %v542_v41, 0.0  ;;  %804 = vmatpush3.bf16.msra.mxu0 %v803_v40 }
 0x389   :  { %805 = vmatprep.subr.bf16.mxu0 %v840_v25 }
 0x38a   :  { %v806_v44 = vpack.c.bf16 %v553_v42, %v552_v43 }
 0x38c   :  { %807 = vmatpush3.bf16.msra.mxu0 %v806_v44 }
 0x38f   :  { %776 = vmatmul.mubr.msk.f32.vlgmr.msra.gmra.mrb[8].mxu0 %vm190_vm2, %v554_v45 }
 0x462   :  { %v630_v47 = vpop.f32.mrb[8].mxu0 }
 0x463   :  { %v631_v48 = vadd.f32 %v630_v47, %v559_v46  ;;  %v777_v49 = vpop.f32.mrb[9].mxu0 }
 0x465   :  { %634 = vst [vmem:[#allocation2] sm:$0x3] %v631_v48 }
 0x466   :  { %826 = shalt.err (!%p823_p4)
}
 0x467   :  { %s827_s5 = scalar_lea.hbm %s1025_s7, 32 }
 0x468   :  { %p828_p5 = scmp.ne.s32.totalorder %s1025_s7, %s827_s5  ;;  %p831_p6 = scmp.lt.u32.totalorder %s827_s5, %s1025_s7 }
 0x46a   :  { %p833_p7 = pnand %p831_p6, %p828_p5 }
 0x46c   :  { %836 = shalt.err (!%p833_p7)
}
 0x46d   :  { %644 = dma.vmem_to_hbm [thread:$0]  %s642_s16, 32, %s1025_s7, [#allocation3]  }
 0x46e   :  { %837 = dma.done.wait [#allocation3], 32  }
 0x46f   :  { %838 = vsyncadd [#allocation3], 4294967264 }
 0x470   :  { %648 = vsyncpa [#allocation3], 1 }

</bundles_post_ra>
